<compile_context>
chip_gen: v7x
topology: tpu7x:2x2x1
jax: 0.10.0
libtpu: 0.0.40
codegen_flags: <defaults>
</compile_context>

<pallas_src>
import functools

import jax
import jax.numpy as jnp
from jax.experimental import pallas as pl
from jax.experimental.pallas import tpu as pltpu

LANE = 128          # TPU lane width; all packed segments use a 128-wide lane layout.
SUBLANE_BF16 = 16   # bf16 sublane packing -> 16-row segment alignment.
H1 = 128            # fc1 output width (fills the lane dimension exactly).


def _round_up(n, m):
    return (n + m - 1) // m * m


def pack_params(w1, b1, w2, b2, w3, b3):
    """Pack all six parameters into one contiguous (rows, 128) bf16 buffer.

    Weights are stored (in_features, out_features). Row layout (all segments
    16-row aligned, zero padded; b3's padded class lanes hold -inf):

      [0,        d_pad)        w1  (d_pad, 128)
      [d_pad,    d_pad+16)     b1  in row 0
      [+16,      +144)         w2  (128, 128), cols 64:128 = 0
      [+144,     +160)         b2  in row 0,   cols 64:128 = 0
      [+160,     +288)         w3  (128, 128), rows 64:, cols nc: = 0
      [+288,     +304)         b3  in row 0,   cols nc:128 = -inf  (class mask)
    """
    d = w1.shape[0]
    nc = w3.shape[1]
    assert nc <= LANE, "num_classes must be <= 128 for this packing"
    d_pad = _round_up(d, SUBLANE_BF16)

    def weight_block(w, rows):
        w = w.astype(jnp.float32)
        w = jnp.pad(w, ((0, rows - w.shape[0]), (0, LANE - w.shape[1])))
        return w.astype(jnp.bfloat16)

    def bias_block(b, lane_pad_value=0.0):
        b = b.reshape(1, -1).astype(jnp.float32)
        b = jnp.pad(b, ((0, 0), (0, LANE - b.shape[1])),
                    constant_values=lane_pad_value)
        b = jnp.pad(b, ((0, SUBLANE_BF16 - 1), (0, 0)))   # unused filler rows
        return b.astype(jnp.bfloat16)

    return jnp.concatenate([
        weight_block(w1, d_pad),                    # d_pad rows
        bias_block(b1),                             # 16 rows
        weight_block(w2, H1),                       # 128 rows
        bias_block(b2),                             # 16 rows
        weight_block(w3, LANE),                     # 128 rows
        bias_block(b3, lane_pad_value=-jnp.inf),    # 16 rows (baked class mask)
    ], axis=0)                                      # total: d_pad + 304 rows


def mlp_kernel(x_ref, p_ref, out_ref, *, d_pad, nc_pad):
    # Static row offsets inside the packed parameter buffer (16-row aligned).
    o_w1 = 0
    o_b1 = o_w1 + d_pad
    o_w2 = o_b1 + SUBLANE_BF16
    o_b2 = o_w2 + H1
    o_w3 = o_b2 + SUBLANE_BF16
    o_b3 = o_w3 + LANE

    x = x_ref[...]                                            # (bm, d_pad) bf16
    w1 = p_ref[o_w1:o_w1 + d_pad, :]                          # (d_pad, 128) bf16
    b1 = p_ref[o_b1:o_b1 + 1, :].astype(jnp.float32)          # (1, 128)
    w2 = p_ref[o_w2:o_w2 + H1, :]                             # (128, 128) pad cols = 0
    b2 = p_ref[o_b2:o_b2 + 1, :].astype(jnp.float32)          # (1, 128)   pad cols = 0
    w3 = p_ref[o_w3:o_w3 + LANE, :]                           # (128, 128) pad rows/cols = 0
    b3 = p_ref[o_b3:o_b3 + 1, :].astype(jnp.float32)          # (1, 128)   pad cols = -inf

    # bf16 MXU inputs, f32 accumulation; bias/ReLU in f32 (VPU).
    h1 = jnp.maximum(
        jnp.dot(x, w1, preferred_element_type=jnp.float32) + b1, 0.0)
    h2 = jnp.maximum(
        jnp.dot(h1.astype(jnp.bfloat16), w2,
                preferred_element_type=jnp.float32) + b2, 0.0)
    logits = jnp.dot(h2.astype(jnp.bfloat16), w3,
                     preferred_element_type=jnp.float32) + b3
    # Padded class lanes carry -inf from b3 (baked at pack time) -> exp == 0.

    # Numerically-stable softmax; exact division so rows sum to 1.
    m = jnp.max(logits, axis=1, keepdims=True)
    e = jnp.exp(logits - m)
    denom = jnp.sum(e, axis=1, keepdims=True)
    probs = e / denom                                          # (bm, 128) f32

    # Lane-dense, narrow writeback: (nc_pad, bm) with batch on the lane axis.
    out_ref[...] = jnp.transpose(probs)[:nc_pad, :].astype(out_ref.dtype)


def _choose_bm(batch, *, max_bm=1024):
    padded = _round_up(batch, 8)
    if padded <= 512:
        # Small batch: a single grid step; splitting only adds per-step overhead.
        return padded
    # Large batch: bm a multiple of 256 (fills the MXU M dim on all
    # generations), grown toward max_bm while keeping >= 4 grid steps so the
    # "parallel" axis shards across both v7x TensorCores with >= 2 steps each.
    bm = 256
    while 2 * bm <= max_bm and _round_up(padded, 2 * bm) // (2 * bm) >= 4:
        bm *= 2
    return bm


def mlp_forward(x, packed_params, *, num_classes, block_batch=None):
    batch, d = x.shape
    d_pad = _round_up(d, SUBLANE_BF16)
    nc_pad = _round_up(num_classes, 8)

    bm = _choose_bm(batch) if block_batch is None else _round_up(block_batch, 8)
    padded_batch = _round_up(batch, bm)

    x = x.astype(jnp.bfloat16)
    if padded_batch != batch or d_pad != d:
        x = jnp.pad(x, ((0, padded_batch - batch), (0, d_pad - d)))

    rows = packed_params.shape[0]
    kernel = functools.partial(mlp_kernel, d_pad=d_pad, nc_pad=nc_pad)

    # Explicit VMEM budget: double-buffered x/out tiles + resident bf16 param
    # slab + f32 intermediate headroom; cap at 64 MiB (v7x physical VMEM).
    pipelined = 2 * bm * d_pad * 2 + 2 * nc_pad * bm * 4
    resident = 2 * rows * LANE * 2
    intermediates = 8 * bm * LANE * 4
    vmem_limit = int(min(max(4 * (pipelined + resident + intermediates),
                             16 << 20), 64 << 20))

    out = pl.pallas_call(
        kernel,
        out_shape=jax.ShapeDtypeStruct((nc_pad, padded_batch), jnp.float32),
        grid_spec=pl.GridSpec(
            grid=(padded_batch // bm,),
            in_specs=[
                # Batch tile of the input: pipelined across grid steps.
                pl.BlockSpec((bm, d_pad), lambda i: (i, 0)),
                # Packed parameters: constant block index -> DMA'd once,
                # VMEM-resident across all grid steps.
                pl.BlockSpec((rows, LANE), lambda i: (0, 0)),
            ],
            out_specs=pl.BlockSpec((nc_pad, bm), lambda i: (0, i)),
        ),
        compiler_params=pltpu.CompilerParams(
            dimension_semantics=("parallel",),
            vmem_limit_bytes=vmem_limit,
        ),
    )(x, packed_params)

    # Transposed slab -> (batch, num_classes) f32.
    return out[:num_classes, :batch].T


def reference_forward(x, w1, b1, w2, b2, w3, b3):
    h1 = jnp.maximum(x @ w1 + b1, 0.0)
    h2 = jnp.maximum(h1 @ w2 + b2, 0.0)
    return jax.nn.softmax(h2 @ w3 + b3, axis=1)


def reference_forward_bf16(x, w1, b1, w2, b2, w3, b3):
    # Mirrors the kernel numerics: bf16 matmul inputs, f32 accumulation,
    # f32 bias/ReLU/softmax.
    f32 = jnp.float32
    bf = lambda a: a.astype(jnp.bfloat16)
    h1 = jnp.maximum(jnp.dot(bf(x), bf(w1), preferred_element_type=f32)
                     + bf(b1).astype(f32), 0.0)
    h2 = jnp.maximum(jnp.dot(bf(h1), bf(w2), preferred_element_type=f32)
                     + bf(b2).astype(f32), 0.0)
    logits = (jnp.dot(bf(h2), bf(w3), preferred_element_type=f32)
              + bf(b3).astype(f32))
    return jax.nn.softmax(logits, axis=1)


if __name__ == "__main__":
    input_dim = 32
    num_classes = 10
    batch = 64

    key = jax.random.PRNGKey(0)
    ks = jax.random.split(key, 7)

    # Deterministic init (PyTorch Linear-style uniform bounds), stored (in, out).
    def init_linear(kw, kb, fan_in, fan_out):
        bound = 1.0 / (fan_in ** 0.5)
        w = jax.random.uniform(kw, (fan_in, fan_out), jnp.float32, -bound, bound)
        b = jax.random.uniform(kb, (fan_out,), jnp.float32, -bound, bound)
        return w, b

    w1, b1 = init_linear(ks[0], ks[1], input_dim, 128)
    w2, b2 = init_linear(ks[2], ks[3], 128, 64)
    w3, b3 = init_linear(ks[4], ks[5], 64, num_classes)
    x = jax.random.normal(ks[6], (batch, input_dim), jnp.float32)

    # Pack weights once (once per model in real use, not per call).
    packed = pack_params(w1, b1, w2, b2, w3, b3)

    # batch=64 -> a single bm=64 grid step (no tiny-tile override).
    out = jax.block_until_ready(mlp_forward(x, packed, num_classes=num_classes))

    assert out.shape == (batch, num_classes)
    assert out.dtype == jnp.float32

    # Tight check against a reference that mirrors the kernel's bf16-input /
    # f32-accumulate numerics.
    ref_bf16 = reference_forward_bf16(x, w1, b1, w2, b2, w3, b3)
    assert jnp.allclose(out, ref_bf16, atol=2e-3, rtol=2e-3), \
        "mismatch vs bf16-quantized reference"

    # Looser sanity check against the pure-f32 reference (bf16 quantization).
    ref_f32 = reference_forward(x, w1, b1, w2, b2, w3, b3)
    assert jnp.allclose(out, ref_f32, atol=3e-2, rtol=3e-2), \
        "mismatch vs f32 reference"

    # Exact softmax normalization (no approx reciprocal anymore).
    assert jnp.allclose(jnp.sum(out, axis=1), 1.0, atol=1e-3), \
        "softmax rows must sum to 1"

    print("KERNEL_OK")
</pallas_src>

<mosaic_0001>
module attributes {stable_mosaic.version = 11 : i64} {
  func.func @mlp_kernel(%arg0: i32, %arg1: memref<64x32xbf16, #tpu.memory_space<vmem>>, %arg2: memref<336x128xbf16, #tpu.memory_space<vmem>>, %arg3: memref<16x64xf32, #tpu.memory_space<vmem>>) attributes {dimension_semantics = [#tpu.dimension_semantics<parallel>], iteration_bounds = array<i64: 1>, scalar_prefetch = 0 : i64, scratch_operands = 0 : i64, tpu.core_type = #tpu.core_type<tc>, window_params = [{transform_indices = @transform_0, window_bounds = array<i64: 64, 32>}, {pipeline_mode = #tpu.pipeline_mode<synchronous>, transform_indices = @transform_1, window_bounds = array<i64: 336, 128>}, {transform_indices = @transform_2, window_bounds = array<i64: 16, 64>}]} {
    %c0 = arith.constant 0 : index
    %c0_0 = arith.constant 0 : index
    %0 = vector.load %arg1[%c0, %c0_0] : memref<64x32xbf16, #tpu.memory_space<vmem>>, vector<64x32xbf16>
    %c0_1 = arith.constant 0 : index
    %c0_2 = arith.constant 0 : index
    %1 = vector.load %arg2[%c0_1, %c0_2] : memref<336x128xbf16, #tpu.memory_space<vmem>>, vector<32x128xbf16>
    %c32 = arith.constant 32 : index
    %c0_3 = arith.constant 0 : index
    %2 = vector.load %arg2[%c32, %c0_3] : memref<336x128xbf16, #tpu.memory_space<vmem>>, vector<1x128xbf16>
    %3 = arith.extf %2 : vector<1x128xbf16> to vector<1x128xf32>
    %c48 = arith.constant 48 : index
    %c0_4 = arith.constant 0 : index
    %4 = vector.load %arg2[%c48, %c0_4] : memref<336x128xbf16, #tpu.memory_space<vmem>>, vector<128x128xbf16>
    %c176 = arith.constant 176 : index
    %c0_5 = arith.constant 0 : index
    %5 = vector.load %arg2[%c176, %c0_5] : memref<336x128xbf16, #tpu.memory_space<vmem>>, vector<1x128xbf16>
    %6 = arith.extf %5 : vector<1x128xbf16> to vector<1x128xf32>
    %c192 = arith.constant 192 : index
    %c0_6 = arith.constant 0 : index
    %7 = vector.load %arg2[%c192, %c0_6] : memref<336x128xbf16, #tpu.memory_space<vmem>>, vector<128x128xbf16>
    %c320 = arith.constant 320 : index
    %c0_7 = arith.constant 0 : index
    %8 = vector.load %arg2[%c320, %c0_7] : memref<336x128xbf16, #tpu.memory_space<vmem>>, vector<1x128xbf16>
    %9 = arith.extf %8 : vector<1x128xbf16> to vector<1x128xf32>
    %cst = arith.constant dense<0.000000e+00> : vector<64x128xf32>
    %10 = tpu.matmul %0, %1, %cst {dimension_numbers = #tpu.dot_dimension_numbers<[1], [0], [0], [1], [0, 0, 1, 1], [], []>} : vector<64x32xbf16>, vector<32x128xbf16>, vector<64x128xf32> -> vector<64x128xf32>
    %11 = vector.broadcast %3 : vector<1x128xf32> to vector<64x128xf32>
    %12 = arith.addf %10, %11 : vector<64x128xf32>
    %cst_8 = arith.constant 0.000000e+00 : f32
    %13 = vector.broadcast %cst_8 : f32 to vector<64x128xf32>
    %14 = arith.maximumf %12, %13 : vector<64x128xf32>
    %15 = arith.truncf %14 : vector<64x128xf32> to vector<64x128xbf16>
    %cst_9 = arith.constant dense<0.000000e+00> : vector<64x128xf32>
    %16 = tpu.matmul %15, %4, %cst_9 {dimension_numbers = #tpu.dot_dimension_numbers<[1], [0], [0], [1], [0, 0, 1, 1], [], []>} : vector<64x128xbf16>, vector<128x128xbf16>, vector<64x128xf32> -> vector<64x128xf32>
    %17 = vector.broadcast %6 : vector<1x128xf32> to vector<64x128xf32>
    %18 = arith.addf %16, %17 : vector<64x128xf32>
    %cst_10 = arith.constant 0.000000e+00 : f32
    %19 = vector.broadcast %cst_10 : f32 to vector<64x128xf32>
    %20 = arith.maximumf %18, %19 : vector<64x128xf32>
    %21 = arith.truncf %20 : vector<64x128xf32> to vector<64x128xbf16>
    %cst_11 = arith.constant dense<0.000000e+00> : vector<64x128xf32>
    %22 = tpu.matmul %21, %7, %cst_11 {dimension_numbers = #tpu.dot_dimension_numbers<[1], [0], [0], [1], [0, 0, 1, 1], [], []>} : vector<64x128xbf16>, vector<128x128xbf16>, vector<64x128xf32> -> vector<64x128xf32>
    %23 = vector.broadcast %9 : vector<1x128xf32> to vector<64x128xf32>
    %24 = arith.addf %22, %23 : vector<64x128xf32>
    %cst_12 = arith.constant dense<0xFF800000> : vector<64xf32>
    %25 = vector.multi_reduction <maximumf>, %24, %cst_12 [1] : vector<64x128xf32> to vector<64xf32>
    %26 = vector.shape_cast %25 : vector<64xf32> to vector<64x1xf32>
    %27 = vector.broadcast %26 : vector<64x1xf32> to vector<64x128xf32>
    %28 = arith.subf %24, %27 : vector<64x128xf32>
    %29 = math.exp %28 : vector<64x128xf32>
    %cst_13 = arith.constant dense<0.000000e+00> : vector<64xf32>
    %30 = vector.multi_reduction <add>, %29, %cst_13 [1] : vector<64x128xf32> to vector<64xf32>
    %31 = vector.shape_cast %30 : vector<64xf32> to vector<64x1xf32>
    %32 = vector.broadcast %31 : vector<64x1xf32> to vector<64x128xf32>
    %33 = arith.divf %29, %32 : vector<64x128xf32>
    %34 = tpu.transpose %33, [1, 0] : vector<64x128xf32> -> vector<128x64xf32>
    %35 = vector.extract_strided_slice %34 {offsets = [0, 0], sizes = [16, 64], strides = [1, 1]} : vector<128x64xf32> to vector<16x64xf32>
    %c0_14 = arith.constant 0 : index
    %c0_15 = arith.constant 0 : index
    %36 = vector.load %arg3[%c0_14, %c0_15] : memref<16x64xf32, #tpu.memory_space<vmem>>, vector<16x64xf32>
    tpu.vector_store %arg3[%c0_14, %c0_15], %35 {strides = array<i32>} : memref<16x64xf32, #tpu.memory_space<vmem>>, vector<16x64xf32>,
    return
  }
  func.func @transform_0(%arg0: i32) -> (i32, i32) {
    %c0_i32 = arith.constant 0 : i32
    %c0_i32_0 = arith.constant 0 : i32
    return %arg0, %c0_i32 : i32, i32
  }
  func.func @transform_1(%arg0: i32) -> (i32, i32) {
    %c0_i32 = arith.constant 0 : i32
    %c0_i32_0 = arith.constant 0 : i32
    %c0_i32_1 = arith.constant 0 : i32
    return %c0_i32, %c0_i32_0 : i32, i32
  }
  func.func @transform_2(%arg0: i32) -> (i32, i32) {
    %c0_i32 = arith.constant 0 : i32
    %c0_i32_0 = arith.constant 0 : i32
    return %c0_i32, %arg0 : i32, i32
  }
}

</mosaic_0001>

<bundles_post_ra>
// kernel: tpu_custom_call.1
= control target key start
LH: loop header
LB: loop body
LE: loop exit
PB: predicated region body
PF: predicated region fallthrough
CT: control target
= control target key end

     0   :  { %7 = vsyncpa [#allocation3], 0  ;;  %s864_s0 = inlined_call_operand.vmem [shape: bf16[64,32], index: 0, kind: input, shape index: {}]   ;;  %s865_s1 = inlined_call_operand.hbm [shape: bf16[336,128], index: 1, kind: input, shape index: {}]   ;;  %s866_s2 = inlined_call_operand.hbm [shape: f32[16,64], index: 2, kind: output, shape index: {}]  }
   0x1   :  { %8 = vsyncpa [#allocation4], 0  ;;  %s798_s9 = smov [#allocation2]   ;;  %s750_s13 = scalar_lea.hbm %s865_s1, 2688 }
   0x2   :  { %s16_s10 = sshll.u32 %s798_s9, 4  ;;  %p751_p0 = scmp.ne.s32.totalorder %s865_s1, %s750_s13  ;;  %s17_s10 = int_to_ptr.vmem [resolvable:$true] %s16_s10 }
   0x3   :  { %p754_p1 = scmp.lt.u32.totalorder %s750_s13, %s865_s1 }
   0x5   :  { %p756_p2 = pnand %p754_p1, %p751_p0 }
   0x7   :  { %759 = shalt.err (!%p756_p2)
}
   0x8   :  { %s760_s18 = scalar_lea.vmem %s17_s10, 2688  ;;  %p765_p4 = scmp.lt.s32.totalorder %s17_s10, %s17_s10 }
   0x9   :  { %p761_p3 = scmp.ne.s32.totalorder %s17_s10, %s760_s18  ;;  %p766_p5 = scmp.lt.s32.totalorder %s760_s18, %s760_s18 }
   0xb   :  { %p767_p6 = por %p766_p5, %p765_p4 }
   0xd   :  { %p768_p7 = pnand %p767_p6, %p761_p3 }
   0xf   :  { %771 = shalt.err (!%p768_p7)
}
  0x10   :  { %s799_s19 = smov 64   ;;  %s800_s20 = smov 4  }
  0x11   :  { %22 = dma.hbm_to_vmem [thread:$0]  %s865_s1, 2688, %s17_s10, [#allocation3], %s799_s19, %s799_s19, %s800_s20  }
  0x12   :  { %794 = dma.done.wait [#allocation3], 2688  }
  0x13   :  { %795 = vsyncadd [#allocation3], 4294964608  ;;  %v696_v0 = vld [vmem:[#allocation2] sm:$0xff]   ;;  %v697_v1 = vld [vmem:[#allocation2 + $0x8] sm:$0xff]   ;;  %vm113_vm0 = vcmask 261120   ;;  %v77_v20 = vlaneseq  ;;  %vm553_vm1 = vcmask 523264  }
  0x14   :  { %629 = vmatprep.subr.bf16.mxu0 %v696_v0  ;;  %v698_v2 = vld [vmem:[%s864_s0] sm:$0xff]   ;;  %v699_v3 = vld [vmem:[%s864_s0 + $0x8] sm:$0xff]   ;;  %v700_v4 = vld [vmem:[%s864_s0 + $0x10] sm:$0xff]  }
  0x15   :  { %630 = vmatpush3.bf16.msra.mxu0 %v696_v0  ;;  %633 = vmatprep.mubr.msk.bf16.mxu0 %vm113_vm0, %v698_v2  ;;  %v702_v5 = vld [vmem:[#allocation2 + $0x18] sm:$0xff]   ;;  %v703_v6 = vld [vmem:[#allocation2 + $0x20] sm:$0xff]   ;;  %v704_v7 = vld [vmem:[#allocation2 + $0x28] sm:$0xff]   ;;  %v78_v21 = vshrl.u32 %v77_v20, 7 }
  0x16   :  { %631 = vmatprep.subr.bf16.mxu0 %v697_v1  ;;  %641 = vmatprep.subr.bf16.mxu1 %v702_v5  ;;  %v701_v8 = vld [vmem:[%s864_s0 + $0x18] sm:$0xff]   ;;  %v705_v9 = vld [vmem:[#allocation2 + $0x30] sm:$0xff]   ;;  %v707_v11 = vld [vmem:[#allocation2 + $0x40] sm:$0xff]   ;;  %s801_s0 = smov [#allocation5]  }
  0x17   :  { %642 = vmatpush3.bf16.msra.mxu1 %v702_v5  ;;  %v706_v10 = vld [vmem:[#allocation2 + $0x38] sm:$0xff]   ;;  %v708_v12 = vld [vmem:[#allocation2 + $0x48] sm:$0xff]   ;;  %v709_v13 = vld [vmem:[#allocation2 + $0x50] sm:$0xff]   ;;  %v847_v24 = vsub.s32 0, %v78_v21  ;;  %s561_s30 = sshll.u32 %s801_s0, 4  ;;  %s562_s30 = int_to_ptr.vmem [resolvable:$true] %s561_s30 }
  0x18   :  { %643 = vmatprep.subr.bf16.mxu1 %v703_v6  ;;  %v710_v14 = vld [vmem:[#allocation2 + $0x60] sm:$0xff]   ;;  %v711_v15 = vld [vmem:[#allocation2 + $0x68] sm:$0xff]   ;;  %v712_v16 = vld [vmem:[#allocation2 + $0x70] sm:$0xff]   ;;  %s772_s3 = scalar_lea.vmem %s562_s30, 256  ;;  %p777_p9 = scmp.lt.s32.totalorder %s562_s30, %s562_s30 }
  0x19   :  { %632 = vmatpush3.bf16.msra.mxu0 %v697_v1  ;;  %v713_v17 = vld [vmem:[#allocation2 + $0x78] sm:$0xff]   ;;  %v714_v18 = vld [vmem:[#allocation2 + $0x80] sm:$0xff]   ;;  %v715_v19 = vld [vmem:[#allocation2 + $0x88] sm:$0xff]   ;;  %p773_p8 = scmp.ne.s32.totalorder %s562_s30, %s772_s3  ;;  %p778_p10 = scmp.lt.s32.totalorder %s772_s3, %s772_s3 }
  0x1a   :  { %665 = vmatprep.subr.bf16.mxu0 %v710_v14  ;;  %v39_v22 = vld [vmem:[#allocation2 + $0x10] sm:$0x1]  ;;  %v717_v55 = vld [vmem:[#allocation2 + $0x98] sm:$0xff]  }
  0x1b   :  { %644 = vmatpush3.bf16.msra.mxu1 %v703_v6  ;;  %v40_v23 = vunpack.c.l.bf16 %v39_v22  ;;  %v716_v54 = vld [vmem:[#allocation2 + $0x90] sm:$0xff]   ;;  %v57_v56 = vld [vmem:[#allocation2 + $0x58] sm:$0x1]  ;;  %p779_p11 = por %p778_p10, %p777_p9 }
  0x1c   :  { %634 = vmatmul.mubr.msk.bf16.vlgmr.msra.gmra.mrb[0].mxu0 %vm113_vm0, %v699_v3  ;;  %645 = vmatprep.subr.bf16.mxu1 %v704_v7  ;;  %v58_v57 = vunpack.c.l.bf16 %v57_v56 }
  0x1d   :  { %637 = vmatprep.mubr.msk.bf16.mxu0 %vm113_vm0, %v700_v4  ;;  %666 = vmatpush3.bf16.msra.mxu0 %v710_v14  ;;  %v80_v25 = vrot.slane %v40_v23, %v847_v24  ;;  %v75_v23 = vld [vmem:[#allocation2 + $0xa0] sm:$0x1]  ;;  %p780_p12 = pnand %p779_p11, %p773_p8 }
  0x1e   :  { %667 = vmatprep.subr.bf16.mxu0 %v711_v15  ;;  %v206_v58 = vrot.slane %v58_v57, %v847_v24 }
  0x1f   :  { %646 = vmatpush3.bf16.msra.mxu1 %v704_v7 }
  0x20   :  { %647 = vmatprep.subr.bf16.mxu1 %v705_v9 }
  0x21   :  { %668 = vmatpush3.bf16.msra.mxu0 %v711_v15 }
  0x22   :  { %669 = vmatprep.subr.bf16.mxu0 %v712_v16 }
  0x23   :  { %648 = vmatpush3.bf16.msra.mxu1 %v705_v9 }
  0x24   :  { %638 = vmatmul.mubr.msk.bf16.gmra.mrb[4].mxu0 %vm113_vm0, %v701_v8  ;;  %649 = vmatprep.subr.bf16.mxu1 %v706_v10 }
  0x25   :  { %670 = vmatpush3.bf16.msra.mxu0 %v712_v16 }
  0x26   :  { %671 = vmatprep.subr.bf16.mxu0 %v713_v17 }
  0x27   :  { %650 = vmatpush3.bf16.msra.mxu1 %v706_v10 }
  0x28   :  { %651 = vmatprep.subr.bf16.mxu1 %v707_v11 }
  0x29   :  { %672 = vmatpush3.bf16.msra.mxu0 %v713_v17 }
  0x2a   :  { %673 = vmatprep.subr.bf16.mxu0 %v714_v18 }
  0x2b   :  { %652 = vmatpush3.bf16.msra.mxu1 %v707_v11 }
  0x2c   :  { %653 = vmatprep.subr.bf16.mxu1 %v708_v12 }
  0x2d   :  { %674 = vmatpush3.bf16.msra.mxu0 %v714_v18 }
  0x2e   :  { %675 = vmatprep.subr.bf16.mxu0 %v715_v19 }
  0x2f   :  { %654 = vmatpush3.bf16.msra.mxu1 %v708_v12 }
  0x30   :  { %655 = vmatprep.subr.bf16.mxu1 %v709_v13 }
  0x31   :  { %676 = vmatpush3.bf16.msra.mxu0 %v715_v19 }
  0x32   :  { %677 = vmatprep.subr.bf16.mxu0 %v716_v54 }
  0x33   :  { %656 = vmatpush3.bf16.msra.mxu1 %v709_v13 }
  0x35   :  { %678 = vmatpush3.bf16.msra.mxu0 %v716_v54 }
  0x36   :  { %679 = vmatprep.subr.bf16.mxu0 %v717_v55 }
  0x39   :  { %680 = vmatpush3.bf16.msra.mxu0 %v717_v55 }
  0xef   :  { %v635_v26 = vpop.f32.mrb[0].mxu0 }
  0xf0   :  { %v169_v27 = vadd.f32 %v635_v26, %v80_v25  ;;  %v160_v28 = vpop.f32.mrb[1].mxu0 }
  0xf1   :  { %v161_v29 = vadd.f32 %v160_v28, %v80_v25  ;;  %v636_v30 = vpop.f32.mrb[2].mxu0 }
  0xf2   :  { %v172_v31 = vadd.f32 %v636_v30, %v80_v25  ;;  %v163_v32 = vpop.f32.mrb[3].mxu0  ;;  %v193_v34 = vmax.f32 %v169_v27, 0.0 }
  0xf3   :  { %v164_v33 = vadd.f32 %v163_v32, %v80_v25  ;;  %v191_v36 = vmax.f32 %v161_v29, 0.0 }
  0xf4   :  { %v194_v35 = vmax.f32 %v172_v31, 0.0 }
  0xf5   :  { %v192_v37 = vmax.f32 %v164_v33, 0.0 }
  0xf6   :  { %v200_v38 = vpack.c.bf16 %v194_v35, %v193_v34 }
  0xf7   :  { %v639_v39 = vpop.f32.mrb[4].mxu0  ;;  %v199_v40 = vpack.c.bf16 %v192_v37, %v191_v36 }
  0xf8   :  { %v185_v41 = vadd.f32 %v639_v39, %v80_v25  ;;  %v176_v42 = vpop.f32.mrb[5].mxu0 }
  0xf9   :  { %v177_v43 = vadd.f32 %v176_v42, %v80_v25  ;;  %v640_v44 = vpop.f32.mrb[6].mxu0  ;;  %657 = vmatprep.mubr.bf16.mxu1 %v199_v40 }
  0xfa   :  { %v197_v45 = vmax.f32 %v185_v41, 0.0  ;;  %v188_v46 = vadd.f32 %v640_v44, %v80_v25  ;;  %v179_v47 = vpop.f32.mrb[7].mxu0  ;;  %658 = vmatmul.mubr.bf16.vlgmr.msra.gmra.mrb[0].mxu1 %v200_v38 }
  0xfb   :  { %v195_v48 = vmax.f32 %v177_v43, 0.0  ;;  %v180_v49 = vadd.f32 %v179_v47, %v80_v25  ;;  %v76_v25 = vunpack.c.l.bf16 %v75_v23 }
  0xfc   :  { %v198_v50 = vmax.f32 %v188_v46, 0.0 }
  0xfd   :  { %v196_v51 = vmax.f32 %v180_v49, 0.0  ;;  %v335_v26 = vrot.slane %v76_v25, %v847_v24 }
  0xfe   :  { %v202_v52 = vpack.c.bf16 %v198_v50, %v197_v45 }
  0xff   :  { %v201_v53 = vpack.c.bf16 %v196_v51, %v195_v48 }
 0x101   :  { %661 = vmatprep.mubr.bf16.mxu1 %v201_v53 }
 0x102   :  { %662 = vmatmul.mubr.bf16.gmra.mrb[4].mxu1 %v202_v52 }
 0x1cd   :  { %v659_v59 = vpop.f32.mrb[0].mxu1 }
 0x1ce   :  { %v298_v60 = vadd.f32 %v659_v59, %v206_v58  ;;  %v289_v61 = vpop.f32.mrb[1].mxu1 }
 0x1cf   :  { %v290_v62 = vadd.f32 %v289_v61, %v206_v58  ;;  %v660_v63 = vpop.f32.mrb[2].mxu1 }
 0x1d0   :  { %v301_v0 = vadd.f32 %v660_v63, %v206_v58  ;;  %v292_v1 = vpop.f32.mrb[3].mxu1  ;;  %v322_v3 = vmax.f32 %v298_v60, 0.0 }
 0x1d1   :  { %v293_v2 = vadd.f32 %v292_v1, %v206_v58  ;;  %v320_v5 = vmax.f32 %v290_v62, 0.0 }
 0x1d2   :  { %v323_v4 = vmax.f32 %v301_v0, 0.0 }
 0x1d3   :  { %v321_v6 = vmax.f32 %v293_v2, 0.0 }
 0x1d4   :  { %v329_v7 = vpack.c.bf16 %v323_v4, %v322_v3 }
 0x1d5   :  { %v328_v8 = vpack.c.bf16 %v321_v6, %v320_v5  ;;  %v663_v9 = vpop.f32.mrb[4].mxu1 }
 0x1d6   :  { %v314_v10 = vadd.f32 %v663_v9, %v206_v58  ;;  %v305_v11 = vpop.f32.mrb[5].mxu1 }
 0x1d7   :  { %v306_v12 = vadd.f32 %v305_v11, %v206_v58  ;;  %v664_v13 = vpop.f32.mrb[6].mxu1  ;;  %681 = vmatprep.mubr.bf16.mxu0 %v328_v8 }
 0x1d8   :  { %v326_v14 = vmax.f32 %v314_v10, 0.0  ;;  %v317_v15 = vadd.f32 %v664_v13, %v206_v58  ;;  %v308_v16 = vpop.f32.mrb[7].mxu1  ;;  %682 = vmatmul.mubr.bf16.vlgmr.msra.gmra.mrb[8].mxu0 %v329_v7 }
 0x1d9   :  { %v324_v17 = vmax.f32 %v306_v12, 0.0  ;;  %v309_v18 = vadd.f32 %v308_v16, %v206_v58 }
 0x1da   :  { %v327_v19 = vmax.f32 %v317_v15, 0.0 }
 0x1db   :  { %v325_v20 = vmax.f32 %v309_v18, 0.0 }
 0x1dc   :  { %v331_v21 = vpack.c.bf16 %v327_v19, %v326_v14 }
 0x1dd   :  { %v330_v22 = vpack.c.bf16 %v325_v20, %v324_v17 }
 0x1df   :  { %685 = vmatprep.mubr.bf16.mxu0 %v330_v22 }
 0x1e0   :  { %686 = vmatmul.mubr.bf16.gmra.mrb[12].mxu0 %v331_v21 }
 0x2ab   :  { %v683_v27 = vpop.f32.mrb[8].mxu0 }
 0x2ac   :  { %v427_v28 = vadd.f32 %v683_v27, %v335_v26  ;;  %v418_v29 = vpop.f32.mrb[9].mxu0 }
 0x2ad   :  { %v419_v30 = vadd.f32 %v418_v29, %v335_v26  ;;  %v684_v31 = vpop.f32.mrb[10].mxu0 }
 0x2ae   :  { %453 = vmax.xlane.f32.xlu1 %v427_v28  ;;  %v421_v32 = vpop.f32.mrb[11].mxu0  ;;  %v430_v33 = vadd.f32 %v684_v31, %v335_v26 }
 0x2af   :  { %449 = vmax.xlane.f32.xlu0 %v419_v30  ;;  %v422_v34 = vadd.f32 %v421_v32, %v335_v26 }
 0x2b2   :  { %455 = vmax.xlane.f32.xlu1 %v430_v33 }
 0x2b3   :  { %v687_v35 = vpop.f32.mrb[12].mxu0  ;;  %451 = vmax.xlane.f32.xlu0 %v422_v34 }
 0x2b4   :  { %v434_v36 = vpop.f32.mrb[13].mxu0  ;;  %v443_v24 = vadd.f32 %v687_v35, %v335_v26 }
 0x2b5   :  { %v435_v37 = vadd.f32 %v434_v36, %v335_v26  ;;  %v688_v38 = vpop.f32.mrb[14].mxu0 }
 0x2b6   :  { %v437_v39 = vpop.f32.mrb[15].mxu0  ;;  %v446_v41 = vadd.f32 %v688_v38, %v335_v26 }
 0x2b7   :  { %v438_v40 = vadd.f32 %v437_v39, %v335_v26  ;;  %457 = vmax.xlane.f32.xlu0 %v435_v37 }
 0x2b9   :  { %459 = vmax.xlane.f32.xlu1 %v438_v40 }
 0x2bb   :  { %461 = vmax.xlane.f32.xlu0 %v443_v24 }
 0x2bd   :  { %463 = vmax.xlane.f32.xlu1 %v446_v41 }
 0x33b   :  { %v454_v42 = vpop.xlane.xlu1 %453 }
 0x33c   :  { %v467_v43 = vsub.f32 %v427_v28, %v454_v42  ;;  %v450_v44 = vpop.xlane.xlu0 %449 }
 0x33d   :  { %v465_v45 = vsub.f32 %v419_v30, %v450_v44 }
 0x33e   :  { %v477_v48 = vmul.f32 1.442695, %v467_v43 }
 0x33f   :  { %v473_v46 = vmul.f32 1.442695, %v465_v45  ;;  %v456_v47 = vpop.xlane.xlu1 %455 }
 0x340   :  { %v468_v49 = vsub.f32 %v430_v33, %v456_v47  ;;  %v452_v50 = vpop.xlane.xlu0 %451 }
 0x341   :  { %718 = vpow2.f32 %v473_v46  ;;  %v466_v51 = vsub.f32 %v422_v34, %v452_v50 }
 0x342   :  { %720 = vpow2.f32 %v477_v48  ;;  %v479_v53 = vmul.f32 1.442695, %v468_v49 }
 0x343   :  { %v475_v52 = vmul.f32 1.442695, %v466_v51 }
 0x344   :  { %v458_v54 = vpop.xlane.xlu0 %457 }
 0x345   :  { %722 = vpow2.f32 %v475_v52  ;;  %v469_v55 = vsub.f32 %v435_v37, %v458_v54 }
 0x346   :  { %v460_v56 = vpop.xlane.xlu1 %459  ;;  %724 = vpow2.f32 %v479_v53 }
 0x347   :  { %v481_v57 = vmul.f32 1.442695, %v469_v55  ;;  %v470_v58 = vsub.f32 %v438_v40, %v460_v56 }
 0x348   :  { %v462_v59 = vpop.xlane.xlu0 %461 }
 0x349   :  { %726 = vpow2.f32 %v481_v57  ;;  %v483_v60 = vmul.f32 1.442695, %v470_v58  ;;  %v471_v61 = vsub.f32 %v443_v24, %v462_v59 }
 0x34a   :  { %v464_v62 = vpop.xlane.xlu1 %463 }
 0x34b   :  { %v719_v63 = vpop.eup %718  ;;  %v485_v0 = vmul.f32 1.442695, %v471_v61  ;;  %v472_v1 = vsub.f32 %v446_v41, %v464_v62  ;;  %728 = vpow2.f32 %v483_v60 }
 0x34c   :  { %489 = vadd.xlane.f32.xlu0 %v719_v63  ;;  %v721_v3 = vpop.eup %720 }
 0x34d   :  { %730 = vpow2.f32 %v485_v0  ;;  %v487_v2 = vmul.f32 1.442695, %v472_v1 }
 0x34f   :  { %v723_v4 = vpop.eup %722  ;;  %732 = vpow2.f32 %v487_v2 }
 0x350   :  { %493 = vadd.xlane.f32.xlu0 %v721_v3  ;;  %491 = vadd.xlane.f32.xlu1 %v723_v4  ;;  %v725_v5 = vpop.eup %724 }
 0x353   :  { %v727_v6 = vpop.eup %726 }
 0x354   :  { %495 = vadd.xlane.f32.xlu1 %v725_v5  ;;  %497 = vadd.xlane.f32.xlu0 %v727_v6 }
 0x355   :  { %v729_v7 = vpop.eup %728 }
 0x357   :  { %v731_v8 = vpop.eup %730 }
 0x358   :  { %499 = vadd.xlane.f32.xlu1 %v729_v7  ;;  %501 = vadd.xlane.f32.xlu0 %v731_v8 }
 0x359   :  { %v733_v9 = vpop.eup %732 }
 0x35c   :  { %503 = vadd.xlane.f32.xlu1 %v733_v9 }
 0x3d9   :  { %v490_v10 = vpop.xlane.xlu0 %489 }
 0x3da   :  { %734 = vrcp.f32 %v490_v10 }
 0x3dd   :  { %v492_v11 = vpop.xlane.xlu1 %491  ;;  %v494_v12 = vpop.xlane.xlu0 %493 }
 0x3de   :  { %736 = vrcp.f32 %v492_v11 }
 0x3df   :  { %738 = vrcp.f32 %v494_v12 }
 0x3e1   :  { %v496_v13 = vpop.xlane.xlu1 %495  ;;  %v498_v15 = vpop.xlane.xlu0 %497 }
 0x3e2   :  { %740 = vrcp.f32 %v496_v13 }
 0x3e3   :  { %742 = vrcp.f32 %v498_v15 }
 0x3e4   :  { %v735_v14 = vpop.eup %734 }
 0x3e5   :  { %v506_v16 = vmul.f32 %v735_v14, %v719_v63  ;;  %v500_v18 = vpop.xlane.xlu1 %499  ;;  %v502_v21 = vpop.xlane.xlu0 %501 }
 0x3e6   :  { %744 = vrcp.f32 %v500_v18 }
 0x3e7   :  { %521 = vxpose.xlu0.b32.start [1/8] (short) (narrow) %v506_v16, 16  ;;  %746 = vrcp.f32 %v502_v21 }
 0x3e8   :  { %v737_v17 = vpop.eup %736 }
 0x3e9   :  { %v508_v19 = vmul.f32 %v737_v17, %v723_v4  ;;  %v739_v20 = vpop.eup %738  ;;  %v504_v25 = vpop.xlane.xlu1 %503 }
 0x3ea   :  { %v510_v22 = vmul.f32 %v739_v20, %v721_v3  ;;  %748 = vrcp.f32 %v504_v25 }
 0x3eb   :  { %522 = vxpose.xlu0.b32.cont [2/8] (short) (narrow) %v508_v19, 16 }
 0x3ec   :  { %v741_v23 = vpop.eup %740 }
 0x3ed   :  { %v512_v26 = vmul.f32 %v741_v23, %v725_v5  ;;  %v743_v27 = vpop.eup %742 }
 0x3ee   :  { %v514_v28 = vmul.f32 %v743_v27, %v727_v6 }
 0x3ef   :  { %523 = vxpose.xlu0.b32.cont [3/8] (short) (narrow) %v510_v22, 16 }
 0x3f0   :  { %v745_v29 = vpop.eup %744 }
 0x3f1   :  { %v516_v30 = vmul.f32 %v745_v29, %v729_v7  ;;  %v747_v31 = vpop.eup %746 }
 0x3f2   :  { %v518_v32 = vmul.f32 %v747_v31, %v731_v8 }
 0x3f3   :  { %524 = vxpose.xlu0.b32.cont [4/8] (short) (narrow) %v512_v26, 16 }
 0x3f4   :  { %v749_v33 = vpop.eup %748 }
 0x3f5   :  { %v520_v34 = vmul.f32 %v749_v33, %v733_v9 }
 0x3f7   :  { %525 = vxpose.xlu0.b32.cont [5/8] (short) (narrow) %v514_v28, 16 }
 0x3fb   :  { %526 = vxpose.xlu0.b32.cont [6/8] (short) (narrow) %v516_v30, 16 }
 0x3ff   :  { %527 = vxpose.xlu0.b32.cont [7/8] (short) (narrow) %v518_v32, 16 }
 0x403   :  { %528 = vxpose.xlu0.b32.end [8/8] (short) (narrow) %v520_v34, 16 }
 0x467   :  { %v537_v35 = vpop.trf.xlu0 }
 0x468   :  { %554 = vst.msk [vmem:[#allocation5] sm:$0xff] %vm553_vm1, %v537_v35 }
 0x46b   :  { %v538_v36 = vpop.trf.xlu0 }
 0x46c   :  { %555 = vst.msk [vmem:[#allocation5 + $0x8] sm:$0xff] %vm553_vm1, %v538_v36 }
 0x46d   :  { %783 = shalt.err (!%p780_p12)
}
 0x46e   :  { %s784_s6 = scalar_lea.hbm %s866_s2, 256 }
 0x46f   :  { %p785_p13 = scmp.ne.s32.totalorder %s866_s2, %s784_s6  ;;  %p788_p0 = scmp.lt.u32.totalorder %s784_s6, %s866_s2 }
 0x471   :  { %p790_p1 = pnand %p788_p0, %p785_p13 }
 0x473   :  { %793 = shalt.err (!%p790_p1)
}
 0x474   :  { %s802_s11 = smov 128   ;;  %s803_s12 = smov 8  }
 0x475   :  { %567 = dma.vmem_to_hbm [thread:$0]  %s562_s30, 256, %s866_s2, [#allocation4], %s802_s11, %s802_s11, %s803_s12  }
 0x476   :  { %796 = dma.done.wait [#allocation4], 256  }
 0x477   :  { %797 = vsyncadd [#allocation4], 4294967040 }
 0x478   :  { %571 = vsyncpa [#allocation3], 1 }
 0x479   :  { %572 = vsyncpa [#allocation4], 1 }

</bundles_post_ra>
